<compile_context>
chip_gen: v6e
topology: v6e:2x2x1
jax: 0.10.0
libtpu: 0.0.40
codegen_flags: <defaults>
</compile_context>

<pallas_src>
import jax
import jax.numpy as jnp
from jax import lax
from jax.experimental import pallas as pl
from jax.experimental.pallas import tpu as pltpu

# Contract the minor (feature) axis of both operands: (H, dim) . (TILE_B, dim)
# -> (H, TILE_B).  Same dimension numbers as the q @ k^T step in the reference
# TPU flash-attention kernel, so it lowers to a native MXU matmul.
_NT_DIMS = (((1,), (1,)), ((), ()))


def _noisy_nn_kernel(logvar_ref, b2_ref, x_ref, w1_hi_ref, w1_lo_ref, b1_ref,
                     w2_ref, o_ref):
    # x: (TILE_B, dim) f32   w1_hi/lo: (H, dim) bf16   b1: (H, 1)   w2: (H, 1)
    x = x_ref[...]
    x_hi = x.astype(jnp.bfloat16)
    x_lo = (x - x_hi.astype(jnp.float32)).astype(jnp.bfloat16)

    # Layer 1: bf16_3x (~Precision.HIGH) = 3 single-pass bf16 MXU matmuls with
    # f32 accumulation; hidden state lands batch-on-lanes as (H, TILE_B).
    h = lax.dot_general(w1_hi_ref[...], x_hi, _NT_DIMS,
                        preferred_element_type=jnp.float32)
    h += lax.dot_general(w1_lo_ref[...], x_hi, _NT_DIMS,
                         preferred_element_type=jnp.float32)
    h += lax.dot_general(w1_hi_ref[...], x_lo, _NT_DIMS,
                         preferred_element_type=jnp.float32)
    h = jnp.maximum(h + b1_ref[...], 0.0)

    # Layer 2 (single output unit) on VPU + XLU instead of an M=1 MXU matmul:
    # per-sublane scale by the weight column, then a sublane reduction.
    out_t = jnp.sum(h * w2_ref[...], axis=0, keepdims=True) + b2_ref[0]  # (1, TILE_B)

    # clamp(logvar, max=20) broadcast along the batch (lane) axis; write the
    # whole (2, TILE_B) block with one unmasked store.
    # torch.cat((out, logvars), dim=-1) == rows 0/1 of the transposed output.
    lv = jnp.minimum(logvar_ref[0], jnp.float32(20.0))
    row = lax.broadcasted_iota(jnp.int32, o_ref.shape, 0)
    o_ref[...] = jnp.where(row == 0, out_t, lv)


def _pick_tile_b(batch, tile_b):
    """Lane-aligned batch tile: big enough to amortize ~0.35us/step overhead,
    capped so double-buffered VMEM fits v5e's 16 MiB scoped default, and (for
    large batches) small enough to keep >= ~8 grid steps for megacore use."""
    lane = 128
    b_lanes = pl.cdiv(batch, lane) * lane
    t = min(int(tile_b), 8192, b_lanes)
    t = max(lane, (t // lane) * lane)
    t_for_8_steps = pl.cdiv(batch, 8 * lane) * lane
    t = min(t, max(512, t_for_8_steps))
    return max(lane, min(t, b_lanes))


def noisy_nn_forward(x, w1, b1, w2, b2, logvar, *, tile_b=4096):
    """Fused Pallas forward.

    x: (B, dim) f32; w1: (H, dim); b1: (H,); w2: (1, H); b2: (1,); logvar: scalar.
    Weights are in PyTorch-native (out_features, in_features) layout.
    Returns (B, 2): column 0 = mlp(x), column 1 = clamp(logvar, max=20).
    """
    B, dim = x.shape
    H = w1.shape[0]

    tile = _pick_tile_b(B, tile_b)
    grid_len = pl.cdiv(B, tile)
    b_pad = grid_len * tile   # padded output width; last x tile may be ragged

    if x.dtype != jnp.float32:
        x = x.astype(jnp.float32)

    # Split w1 into bf16 hi/lo parts once wrapper-side (tiny, VMEM-resident).
    w1f = w1.astype(jnp.float32).reshape(H, dim)
    w1_hi = w1f.astype(jnp.bfloat16)
    w1_lo = (w1f - w1_hi.astype(jnp.float32)).astype(jnp.bfloat16)

    b1_col = b1.astype(jnp.float32).reshape(H, 1)       # (H, 1)
    w2_col = w2.astype(jnp.float32).reshape(H, 1)       # (H, 1) column for VPU layer 2
    b2_s = jnp.asarray(b2, jnp.float32).reshape(1)      # SMEM scalar
    logvar_s = jnp.asarray(logvar, jnp.float32).reshape(1)

    cost = pl.CostEstimate(
        flops=3 * 2 * B * dim * H + 3 * B * H,
        transcendentals=0,
        bytes_accessed=4 * B * dim + 4 * 2 * b_pad + 2 * 2 * H * dim + 4 * (2 * H + 2),
    )

    out_t = pl.pallas_call(
        _noisy_nn_kernel,
        out_shape=jax.ShapeDtypeStruct((2, b_pad), jnp.float32),
        grid=(grid_len,),
        in_specs=[
            pl.BlockSpec(memory_space=pltpu.SMEM),               # logvar scalar
            pl.BlockSpec(memory_space=pltpu.SMEM),               # b2 scalar
            pl.BlockSpec((tile, dim), lambda i: (i, 0)),         # x batch tile (no transpose/pad)
            pl.BlockSpec((H, dim), lambda i: (0, 0)),            # w1 hi (VMEM-resident)
            pl.BlockSpec((H, dim), lambda i: (0, 0)),            # w1 lo (VMEM-resident)
            pl.BlockSpec((H, 1), lambda i: (0, 0)),              # b1 (resident)
            pl.BlockSpec((H, 1), lambda i: (0, 0)),              # w2 column (resident)
        ],
        out_specs=pl.BlockSpec((2, tile), lambda i: (0, i)),     # lane-dense slab
        compiler_params=pltpu.CompilerParams(
            dimension_semantics=("parallel",),                   # v7x: shard tiles over 2 TCs
        ),
        cost_estimate=cost,
    )(logvar_s, b2_s, x, w1_hi, w1_lo, b1_col, w2_col)

    # Back to (B, 2); drop padded batch columns. Layout plumbing only.
    return out_t.T[:B]


def reference_forward(x, w1, b1, w2, b2, logvar):
    """Pure-JAX reference (PyTorch semantics, PyTorch weight layout)."""
    h = jnp.maximum(
        jnp.dot(x, w1.T, precision=jax.lax.Precision.HIGHEST) + b1, 0.0)
    out = jnp.dot(h, w2.T, precision=jax.lax.Precision.HIGHEST) + b2
    logvars = jnp.minimum(logvar, 20.0) * jnp.ones_like(out)
    return jnp.concatenate([out, logvars], axis=-1)


def noisy_nn(x, w1, b1, w2, b2, logvar, *, kernel_batch_threshold=4096, tile_b=4096):
    """Dispatcher: small batches are cheaper via plain XLA fusion (fixed
    pallas_call + pipeline warm-up overhead dominates below a few tiles)."""
    if x.shape[0] < kernel_batch_threshold:
        return reference_forward(x, w1, b1, w2, b2, logvar)
    return noisy_nn_forward(x, w1, b1, w2, b2, logvar, tile_b=tile_b)


def init_params(key, dim, num_hiddens=(50,), nout=1):
    """Deterministic params in PyTorch-native layout (out_features, in_features).
    Linear weights: xavier_uniform_ (as in NN.__init__); biases: PyTorch default
    uniform(-1/sqrt(fan_in), 1/sqrt(fan_in))."""
    h = num_hiddens[0]
    k1, k2, k3, k4 = jax.random.split(key, 4)

    def xavier(k, fan_out, fan_in):
        bound = jnp.sqrt(6.0 / (fan_in + fan_out))
        return jax.random.uniform(k, (fan_out, fan_in), jnp.float32, -bound, bound)

    def bias(k, fan_in, fan_out):
        bound = 1.0 / jnp.sqrt(fan_in)
        return jax.random.uniform(k, (fan_out,), jnp.float32, -bound, bound)

    w1 = xavier(k1, h, dim)        # (50, dim)
    b1 = bias(k2, dim, h)          # (50,)
    w2 = xavier(k3, nout, h)       # (1, 50)
    b2 = bias(k4, h, nout)         # (1,)
    logvar = jnp.log(jnp.float32(0.001))   # nn.Parameter(logvar) initial value
    return w1, b1, w2, b2, logvar


if __name__ == "__main__":
    key = jax.random.PRNGKey(0)
    k_param, k_x = jax.random.split(key)

    # Small but grid-exercising shapes: with tile_b=256 this runs a 4-step grid
    # whose last x tile is ragged (rows 768..999 valid), covering the masked
    # boundary-DMA path; dim/hidden match the module defaults.
    batch, dim = 1000, 32
    w1, b1, w2, b2, logvar = init_params(k_param, dim, num_hiddens=(50,), nout=1)
    x = jax.random.normal(k_x, (batch, dim), jnp.float32)

    y = noisy_nn_forward(x, w1, b1, w2, b2, logvar, tile_b=256)
    y = jax.block_until_ready(y)

    y_ref = reference_forward(x, w1, b1, w2, b2, logvar)
    assert y.shape == (batch, 2), y.shape
    max_err = float(jnp.max(jnp.abs(y - y_ref)))
    # Layer 1 is bf16_3x (Precision.HIGH-equivalent): errors are a few e-6 here,
    # comfortably inside 5e-5 while still catching any layout/weight bug.
    assert jnp.allclose(y, y_ref, atol=5e-5, rtol=5e-5), max_err

    print("KERNEL_OK")
</pallas_src>

<mosaic_0001>
module attributes {stable_mosaic.version = 11 : i64} {
  func.func @_noisy_nn_kernel(%arg0: i32, %arg1: memref<1xf32, #tpu.memory_space<smem>>, %arg2: memref<1xf32, #tpu.memory_space<smem>>, %arg3: memref<256x32xf32, #tpu.memory_space<vmem>>, %arg4: memref<50x32xbf16, #tpu.memory_space<vmem>>, %arg5: memref<50x32xbf16, #tpu.memory_space<vmem>>, %arg6: memref<50x1xf32, #tpu.memory_space<vmem>>, %arg7: memref<50x1xf32, #tpu.memory_space<vmem>>, %arg8: memref<2x256xf32, #tpu.memory_space<vmem>>) attributes {dimension_semantics = [#tpu.dimension_semantics<parallel>], iteration_bounds = array<i64: 4>, scalar_prefetch = 0 : i64, scratch_operands = 0 : i64, tpu.core_type = #tpu.core_type<tc>, window_params = [{transform_indices = @transform_0, window_bounds = array<i64: 1>}, {transform_indices = @transform_1, window_bounds = array<i64: 1>}, {transform_indices = @transform_2, window_bounds = array<i64: 256, 32>}, {pipeline_mode = #tpu.pipeline_mode<synchronous>, transform_indices = @transform_3, window_bounds = array<i64: 50, 32>}, {pipeline_mode = #tpu.pipeline_mode<synchronous>, transform_indices = @transform_4, window_bounds = array<i64: 50, 32>}, {pipeline_mode = #tpu.pipeline_mode<synchronous>, transform_indices = @transform_5, window_bounds = array<i64: 50, 1>}, {pipeline_mode = #tpu.pipeline_mode<synchronous>, transform_indices = @transform_6, window_bounds = array<i64: 50, 1>}, {transform_indices = @transform_7, window_bounds = array<i64: 2, 256>}]} {
    %c0 = arith.constant 0 : index
    %c0_0 = arith.constant 0 : index
    %0 = vector.load %arg3[%c0, %c0_0] : memref<256x32xf32, #tpu.memory_space<vmem>>, vector<256x32xf32>
    %1 = arith.truncf %0 : vector<256x32xf32> to vector<256x32xbf16>
    %2 = arith.extf %1 : vector<256x32xbf16> to vector<256x32xf32>
    %3 = arith.subf %0, %2 : vector<256x32xf32>
    %4 = arith.truncf %3 : vector<256x32xf32> to vector<256x32xbf16>
    %c0_1 = arith.constant 0 : index
    %c0_2 = arith.constant 0 : index
    %5 = vector.load %arg4[%c0_1, %c0_2] : memref<50x32xbf16, #tpu.memory_space<vmem>>, vector<50x32xbf16>
    %cst = arith.constant dense<0.000000e+00> : vector<50x256xf32>
    %6 = tpu.matmul %5, %1, %cst {dimension_numbers = #tpu.dot_dimension_numbers<[1], [1], [0], [0], [0, 0, 1, 0], [], []>} : vector<50x32xbf16>, vector<256x32xbf16>, vector<50x256xf32> -> vector<50x256xf32>
    %c0_3 = arith.constant 0 : index
    %c0_4 = arith.constant 0 : index
    %7 = vector.load %arg5[%c0_3, %c0_4] : memref<50x32xbf16, #tpu.memory_space<vmem>>, vector<50x32xbf16>
    %cst_5 = arith.constant dense<0.000000e+00> : vector<50x256xf32>
    %8 = tpu.matmul %7, %1, %cst_5 {dimension_numbers = #tpu.dot_dimension_numbers<[1], [1], [0], [0], [0, 0, 1, 0], [], []>} : vector<50x32xbf16>, vector<256x32xbf16>, vector<50x256xf32> -> vector<50x256xf32>
    %9 = arith.addf %6, %8 : vector<50x256xf32>
    %c0_6 = arith.constant 0 : index
    %c0_7 = arith.constant 0 : index
    %10 = vector.load %arg4[%c0_6, %c0_7] : memref<50x32xbf16, #tpu.memory_space<vmem>>, vector<50x32xbf16>
    %cst_8 = arith.constant dense<0.000000e+00> : vector<50x256xf32>
    %11 = tpu.matmul %10, %4, %cst_8 {dimension_numbers = #tpu.dot_dimension_numbers<[1], [1], [0], [0], [0, 0, 1, 0], [], []>} : vector<50x32xbf16>, vector<256x32xbf16>, vector<50x256xf32> -> vector<50x256xf32>
    %12 = arith.addf %9, %11 : vector<50x256xf32>
    %c0_9 = arith.constant 0 : index
    %c0_10 = arith.constant 0 : index
    %13 = vector.load %arg6[%c0_9, %c0_10] : memref<50x1xf32, #tpu.memory_space<vmem>>, vector<50x1xf32>
    %14 = vector.broadcast %13 : vector<50x1xf32> to vector<50x256xf32>
    %15 = arith.addf %12, %14 : vector<50x256xf32>
    %cst_11 = arith.constant 0.000000e+00 : f32
    %16 = vector.broadcast %cst_11 : f32 to vector<50x256xf32>
    %17 = arith.maximumf %15, %16 : vector<50x256xf32>
    %c0_12 = arith.constant 0 : index
    %c0_13 = arith.constant 0 : index
    %18 = vector.load %arg7[%c0_12, %c0_13] : memref<50x1xf32, #tpu.memory_space<vmem>>, vector<50x1xf32>
    %19 = vector.broadcast %18 : vector<50x1xf32> to vector<50x256xf32>
    %20 = arith.mulf %17, %19 : vector<50x256xf32>
    %cst_14 = arith.constant dense<0.000000e+00> : vector<256xf32>
    %21 = vector.multi_reduction <add>, %20, %cst_14 [0] : vector<50x256xf32> to vector<256xf32>
    %22 = vector.shape_cast %21 : vector<256xf32> to vector<1x256xf32>
    %c0_15 = arith.constant 0 : index
    %23 = memref.load %arg2[%c0_15] : memref<1xf32, #tpu.memory_space<smem>>
    %24 = vector.broadcast %23 : f32 to vector<1x256xf32>
    %25 = arith.addf %22, %24 : vector<1x256xf32>
    %c0_16 = arith.constant 0 : index
    %26 = memref.load %arg1[%c0_16] : memref<1xf32, #tpu.memory_space<smem>>
    %cst_17 = arith.constant 2.000000e+01 : f32
    %27 = arith.minimumf %26, %cst_17 : f32
    %28 = tpu.iota {dimensions = array<i32: 0>} : vector<2x256xi32>
    %c0_i32 = arith.constant 0 : i32
    %29 = vector.broadcast %c0_i32 : i32 to vector<2x256xi32>
    %30 = arith.cmpi eq, %28, %29 : vector<2x256xi32>
    %31 = vector.shape_cast %25 : vector<1x256xf32> to vector<1x256xf32>
    %32 = vector.broadcast %31 : vector<1x256xf32> to vector<2x256xf32>
    %33 = vector.broadcast %27 : f32 to vector<2x256xf32>
    %34 = arith.select %30, %32, %33 : vector<2x256xi1>, vector<2x256xf32>
    %c0_18 = arith.constant 0 : index
    %c0_19 = arith.constant 0 : index
    %35 = vector.load %arg8[%c0_18, %c0_19] : memref<2x256xf32, #tpu.memory_space<vmem>>, vector<2x256xf32>
    tpu.vector_store %arg8[%c0_18, %c0_19], %34 {strides = array<i32>} : memref<2x256xf32, #tpu.memory_space<vmem>>, vector<2x256xf32>,
    return
  }
  func.func @transform_0(%arg0: i32) -> i32 {
    %c0_i32 = arith.constant 0 : i32
    %c0_i32_0 = arith.constant 0 : i32
    return %c0_i32 : i32
  }
  func.func @transform_1(%arg0: i32) -> i32 {
    %c0_i32 = arith.constant 0 : i32
    %c0_i32_0 = arith.constant 0 : i32
    return %c0_i32 : i32
  }
  func.func @transform_2(%arg0: i32) -> (i32, i32) {
    %c0_i32 = arith.constant 0 : i32
    %c0_i32_0 = arith.constant 0 : i32
    return %arg0, %c0_i32 : i32, i32
  }
  func.func @transform_3(%arg0: i32) -> (i32, i32) {
    %c0_i32 = arith.constant 0 : i32
    %c0_i32_0 = arith.constant 0 : i32
    %c0_i32_1 = arith.constant 0 : i32
    return %c0_i32, %c0_i32_0 : i32, i32
  }
  func.func @transform_4(%arg0: i32) -> (i32, i32) {
    %c0_i32 = arith.constant 0 : i32
    %c0_i32_0 = arith.constant 0 : i32
    %c0_i32_1 = arith.constant 0 : i32
    return %c0_i32, %c0_i32_0 : i32, i32
  }
  func.func @transform_5(%arg0: i32) -> (i32, i32) {
    %c0_i32 = arith.constant 0 : i32
    %c0_i32_0 = arith.constant 0 : i32
    %c0_i32_1 = arith.constant 0 : i32
    return %c0_i32, %c0_i32_0 : i32, i32
  }
  func.func @transform_6(%arg0: i32) -> (i32, i32) {
    %c0_i32 = arith.constant 0 : i32
    %c0_i32_0 = arith.constant 0 : i32
    %c0_i32_1 = arith.constant 0 : i32
    return %c0_i32, %c0_i32_0 : i32, i32
  }
  func.func @transform_7(%arg0: i32) -> (i32, i32) {
    %c0_i32 = arith.constant 0 : i32
    %c0_i32_0 = arith.constant 0 : i32
    return %c0_i32, %arg0 : i32, i32
  }
}

</mosaic_0001>

<bundles_post_ra>
// kernel: tpu_custom_call.1
= control target key start
LH: loop header
LB: loop body
LE: loop exit
PB: predicated region body
PF: predicated region fallthrough
CT: control target
= control target key end

     0   :  { %s1908_s0 = inlined_call_operand.<no memory space> [shape: f32[1], index: 0, kind: input, shape index: {}]   ;;  %s1909_s1 = inlined_call_operand.<no memory space> [shape: f32[1], index: 1, kind: input, shape index: {}]   ;;  %s1910_s2 = inlined_call_operand.vmem [shape: f32[1000,32], index: 2, kind: input, shape index: {}]   ;;  %s1911_s3 = inlined_call_operand.vmem [shape: bf16[50,32], index: 3, kind: input, shape index: {}]   ;;  %s1912_s4 = inlined_call_operand.vmem [shape: bf16[50,32], index: 4, kind: input, shape index: {}]   ;;  %s1913_s5 = inlined_call_operand.vmem [shape: f32[50,1], index: 5, kind: input, shape index: {}]   ;;  %s1914_s6 = inlined_call_operand.vmem [shape: f32[50,1], index: 6, kind: input, shape index: {}]   ;;  %s1915_s7 = inlined_call_operand.hbm [shape: f32[2,1024], index: 7, kind: output, shape index: {}]  }
   0x1   :  { %12 = sst [smem:[#allocation2]] %s1908_s0 }
   0x2   :  { %13 = sst [smem:[#allocation3]] %s1909_s1 }
   0x3   :  { %14 = vsyncpa [#allocation5], 0 }
   0x4   :  { %16 = vsyncpa [#allocation5 + $0x1], 0  ;;  %s1396_s28 = smov 0   ;;  %s1398_s29 = smov 0  }
   0x5   :  { %s1400_s30 = smov 0   ;;  %s1402_s8 = smov 0  }
   0x6 LB: > { %s1417_s0 = sadd.s32 4294967295, %s1345_s8   ;;  %s1080_s1 = sadd.s32 4294967294, %s1345_s8   ;;  %s1345_s8 = sphi %s1402_s8, %s1921_s8   ;;  %s1341_s30 = sphi %s1400_s30, %s1920_s30   ;;  %s1337_s29 = sphi %s1398_s29, %s1919_s29   ;;  %s1333_s28 = sphi %s1396_s28, %s1918_s28  }
   0x7   : > { %s1421_s9 = sadd.s32 1, %s1345_s8   ;;  %s181_s10 = sadd.s32 1, %s1341_s30 }
   0x8   : > { %s178_s11 = ssub.s32 %s1345_s8, %s1421_s9  ;;  %p191_p0 = scmp.ne.s32.totalorder %s1341_s30, %s1337_s29 }
   0x9   : > { %p179_p1 = scmp.eq.s32.totalorder %s178_s11, 0  ;;  %p192_p2 = scmp.eq.s32.totalorder %s1417_s0, 3 }
   0xa   : > { %p197_p3 = scmp.ne.s32.totalorder %s1337_s29, %s1333_s28  ;;  %p198_p4 = scmp.eq.s32.totalorder %s1080_s1, 3 }
   0xb   : > { %s1432_s12 = scalar_select %p179_p1, %s1341_s30, %s181_s10  }
   0xc   : > { %p1434_p5 = por %p192_p2, %p191_p0  ;;  %p1438_p6 = por %p198_p4, %p197_p3 }
   0xd   : > { %p1083_p7 = scmp.ge.s32.totalorder %s1345_s8, 1  ;;  %p251_p8 = scmp.lt.s32.totalorder %s1345_s8, 5 }
   0xf   : > { %p252_p9 = pnand %p1083_p7, %p251_p8 }
  0x10   : > { %s1085_s15 = sshll.u32 (!%p252_p9), %s1417_s0, 5  ;;  %s982_s17 = sld [smem:[#allocation3]] (!%p252_p9) }
  0x11   : > { %255 = sbr.rel (%p252_p9) target bundleno = 410 (0x19a), region = 48  ;;  %p292_p10 = scmp.lt.s32.totalorder (!%p252_p9), %s1085_s15, 124 }
  0x12   : > { %s986_s18 = sld [smem:[#allocation2]] (!%p252_p9)  ;;  %s284_s19 = sand.u32 (!%p252_p9), 1, %s1337_s29  }
  0x13   : > { %s1113_s22 = sshll.u32 (!%p252_p9), %s1417_s0, 6  ;;  %s1007_s10 = scalar_lea.sflag (!%p252_p9), [#allocation5], %s284_s19 }
  0x14   : > { %s1019_s1 = scalar_lea.hbm (!%p252_p9), %s1915_s7, %s1113_s22 }
  0x16   : > { %v1448_v0 = vld [vmem:[%s1912_s4] sm:$0xff]   ;;  %vm463_vm0 = vcmask 261120   ;;  %s1923_s15 = smov (!%p292_p10, %s1085_s15), 124  ;;  %v831_v36 = vld [vmem:[%s1913_s5 + $0x10] sm:$0xff]  ;;  %v1347_v40 = vmov 0   ;;  %v830_v41 = vld [vmem:[%s1913_s5 + $0x8] sm:$0xff] }
  0x17   : > { %v1453_v1 = vld [vmem:[%s1911_s3] sm:$0xff]   ;;  %1130 = vmatprep.mubr.msk.bf16.mxu0 %vm463_vm0, %v1448_v0  ;;  %s1086_s20 = sshll.u32 %s1923_s15, 3  ;;  %1275 = vset.pattern.permute.xlu0 %v1347_v40  ;;  %v832_v42 = vld [vmem:[%s1913_s5 + $0x18] sm:$0xff]  ;;  %v900_v48 = vld [vmem:[%s1914_s6 + $0x8] sm:$0xff]  ;;  %vm960_vm1 = vcmask 1041408   ;;  %s1349_s15 = smov [#allocation4]  }
  0x18   : > { %1154 = vmatprep.mubr.msk.bf16.mxu1 %vm463_vm0, %v1453_v1  ;;  %s1462_s23 = scalar_lea.vmem %s1910_s2, %s1086_s20  ;;  %v829_v35 = vld [vmem:[%s1913_s5] sm:$0xff]  ;;  %1276 = vset.pattern.permute.xlu1 %v1347_v40  ;;  %v901_v53 = vld [vmem:[%s1914_s6 + $0x10] sm:$0xff]  ;;  %v834_v58 = vld [vmem:[%s1913_s5 + $0x28] sm:$0xff]  ;;  %s1084_s20 = sshll.u32 %s284_s19, 2 }
  0x19   : > { %v1465_v2 = vld [vmem:[%s1462_s23 + $0xf0] sm:$0xff]  ;;  %v1468_v3 = vld [vmem:[%s1462_s23 + $0xf8] sm:$0xff]  ;;  %v1481_v7 = vld [vmem:[%s1462_s23 + $0xe0] sm:$0xff]  ;;  %838 = vperm.xlu0 %1275, %v829_v35   ;;  %848 = vperm.xlu1 %1276, %v831_v36   ;;  %s286_s24 = scalar_lea.vmem [#allocation4], %s1084_s20  ;;  %s1289_s16 = sshll.u32 %s1349_s15, 4  ;;  %s1290_s16 = int_to_ptr.vmem [resolvable:$false] %s1289_s16 }
  0x1a   : > { %v1471_v4 = vld [vmem:[%s1462_s23 + $0x70] sm:$0xff]  ;;  %v1475_v5 = vpack.c.bf16 %v1468_v3, %v1465_v2  ;;  %v1478_v6 = vld [vmem:[%s1462_s23 + $0x78] sm:$0xff]  ;;  %v1484_v8 = vld [vmem:[%s1462_s23 + $0xe8] sm:$0xff]  ;;  %s1021_s25 = sshll.u32 %s286_s24, 4  ;;  %s1291_s0 = scalar_lea.vmem %s1290_s16, 128  ;;  %s1022_s25 = int_to_ptr.vmem [resolvable:$true] %s1021_s25 }
  0x1b   : > { %v1488_v9 = vpack.c.bf16 %v1478_v6, %v1471_v4  ;;  %v1492_v10 = vpack.c.bf16 %v1484_v8, %v1481_v7  ;;  %v1499_v11 = vld [vmem:[%s1462_s23 + $0x60] sm:$0xff]  ;;  %v1502_v12 = vld [vmem:[%s1462_s23 + $0x68] sm:$0xff]  ;;  %v1515_v15 = vld [vmem:[%s1462_s23 + $0xd0] sm:$0xff]  ;;  %s1285_s11 = scalar_lea.vmem %s1022_s25, 64  ;;  %p1292_p0 = scmp.lt.s32.totalorder %s1022_s25, %s1290_s16 }
  0x1c   : > { %1202 = vmatprep.subr.msk.bf16.mxu0 %vm463_vm0, %v1475_v5  ;;  %1210 = vmatprep.subr.msk.bf16.mxu1 %vm463_vm0, %v1475_v5  ;;  %v1512_v14 = vpack.c.bf16 %v1502_v12, %v1499_v11  ;;  %v1518_v16 = vld [vmem:[%s1462_s23 + $0xd8] sm:$0xff]  ;;  %v1527_v19 = vld [vmem:[%s1462_s23 + $0x50] sm:$0xff]  ;;  %v1541_v22 = vld [vmem:[%s1462_s23 + $0xc0] sm:$0xff]  ;;  %v382_v35 = vunpack.c.h.bf16 %v1475_v5  ;;  %p1286_p11 = scmp.ne.s32.totalorder %s1022_s25, %s1285_s11  ;;  %p1293_p1 = scmp.lt.s32.totalorder %s1291_s0, %s1285_s11 }
  0x1d   : > { %v498_v13 = vsel %vm463_vm0, %v1488_v9, 0  ;;  %v1524_v18 = vpack.c.bf16 %v1518_v16, %v1515_v15  ;;  %v1530_v20 = vld [vmem:[%s1462_s23 + $0x58] sm:$0xff]  ;;  %v1544_v23 = vld [vmem:[%s1462_s23 + $0xc8] sm:$0xff]  ;;  %v1553_v26 = vld [vmem:[%s1462_s23 + $0x40] sm:$0xff]  ;;  %843 = vperm.xlu0 %1275, %v830_v41   ;;  %853 = vperm.xlu1 %1276, %v832_v42   ;;  %v365_v41 = vunpack.c.l.bf16 %v1488_v9  ;;  %v366_v42 = vunpack.c.h.bf16 %v1488_v9 }
  0x1e   : > { %1115 = vmatpush3.bf16.xpose.msra.mxu0 %v498_v13  ;;  %1139 = vmatpush3.bf16.xpose.msra.mxu1 %v498_v13  ;;  %v495_v17 = vsel %vm463_vm0, %v1512_v14, 0  ;;  %v1538_v21 = vpack.c.bf16 %v1530_v20, %v1527_v19  ;;  %v1550_v25 = vpack.c.bf16 %v1544_v23, %v1541_v22  ;;  %v1556_v27 = vld [vmem:[%s1462_s23 + $0x48] sm:$0xff]  ;;  %v1567_v29 = vld [vmem:[%s1462_s23 + $0xb0] sm:$0xff]  ;;  %v1570_v30 = vld [vmem:[%s1462_s23 + $0xb8] sm:$0xff]  ;;  %p1287_p12 = pnand %p1286_p11, %p1434_p5  ;;  %p1294_p2 = por %p1293_p1, %p1292_p0 }
  0x1f   : > { %1203 = vmatprep.subr.msk.bf16.mxu0 %vm463_vm0, %v1492_v10  ;;  %1211 = vmatprep.subr.msk.bf16.mxu1 %vm463_vm0, %v1492_v10  ;;  %v1564_v28 = vpack.c.bf16 %v1556_v27, %v1553_v26  ;;  %v1576_v32 = vpack.c.bf16 %v1570_v30, %v1567_v29  ;;  %v1579_v33 = vld [vmem:[%s1462_s23 + $0x30] sm:$0xff]  ;;  %v1582_v34 = vld [vmem:[%s1462_s23 + $0x38] sm:$0xff]  ;;  %v1599_v38 = vld [vmem:[%s1462_s23 + $0xa0] sm:$0xff] }
  0x20   : > { %v492_v24 = vsel %vm463_vm0, %v1538_v21, 0  ;;  %v1596_v37 = vpack.c.bf16 %v1582_v34, %v1579_v33  ;;  %v1602_v39 = vld [vmem:[%s1462_s23 + $0xa8] sm:$0xff]  ;;  %v1617_v45 = vld [vmem:[%s1462_s23 + $0x20] sm:$0xff]  ;;  %v1637_v50 = vld [vmem:[%s1462_s23 + $0x90] sm:$0xff]  ;;  %p1288_p13 = pneg %p1287_p12 }
  0x21   : > { %v489_v31 = vsel %vm463_vm0, %v1564_v28, 0  ;;  %v1614_v44 = vpack.c.bf16 %v1602_v39, %v1599_v38  ;;  %v1620_v46 = vld [vmem:[%s1462_s23 + $0x28] sm:$0xff]  ;;  %v899_v47 = vld [vmem:[%s1914_s6] sm:$0xff]  ;;  %v1640_v51 = vld [vmem:[%s1462_s23 + $0x98] sm:$0xff]  ;;  %913 = vperm.xlu1 %1276, %v900_v48   ;;  %v414_v48 = vsub.f32 %v1468_v3, %v382_v35 }
  0x22   : > { %v486_v43 = vsel %vm463_vm0, %v1596_v37, 0  ;;  %v1634_v49 = vpack.c.bf16 %v1620_v46, %v1617_v45  ;;  %908 = vperm.xlu0 %1275, %v899_v47   ;;  %v833_v52 = vld [vmem:[%s1913_s5 + $0x20] sm:$0xff]  ;;  %v1652_v55 = vpack.c.bf16 %v1640_v51, %v1637_v50  ;;  %v1655_v56 = vld [vmem:[%s1462_s23 + $0x10] sm:$0xff]  ;;  %v1658_v57 = vld [vmem:[%s1462_s23 + $0x18] sm:$0xff]  ;;  %p1295_p3 = pnand %p1294_p2, %p1288_p13 }
  0x23   : > { %v902_v59 = vld [vmem:[%s1914_s6 + $0x18] sm:$0xff]  ;;  %v1672_v60 = vpack.c.bf16 %v1658_v57, %v1655_v56  ;;  %v1675_v61 = vld [vmem:[%s1462_s23 + $0x80] sm:$0xff]  ;;  %v1678_v62 = vld [vmem:[%s1462_s23 + $0x88] sm:$0xff] }
  0x24   : > { %v483_v54 = vsel %vm463_vm0, %v1634_v49, 0  ;;  %v835_v63 = vld [vmem:[%s1913_s5 + $0x30] sm:$0x3]  ;;  %v903_v13 = vld [vmem:[%s1914_s6 + $0x20] sm:$0xff]  ;;  %v1698_v40 = vld [vmem:[%s1462_s23 + $0x8] sm:$0xff] }
  0x25   : > { %918 = vperm.xlu1 %1276, %v901_v53   ;;  %v1695_v36 = vld [vmem:[%s1462_s23] sm:$0xff]  ;;  %v398_v53 = vsub.f32 %v1478_v6, %v366_v42  ;;  %v364_v6 = vunpack.c.h.bf16 %v1512_v14  ;;  %v378_v42 = vunpack.c.h.bf16 %v1524_v18  ;;  %s1348_s23 = smov 20.0  }
  0x26   : > { %1117 = vmatpush3.bf16.xpose.msra.mxu0 %v495_v17  ;;  %1141 = vmatpush3.bf16.xpose.msra.mxu1 %v495_v17  ;;  %v480_v17 = vsel %vm463_vm0, %v1672_v60, 0  ;;  %v1714_v47 = vpack.c.bf16 %v1698_v40, %v1695_v36  ;;  %s987_s21 = smin.f32 %s1348_s23, %s986_s18 }
  0x27   : > { %1204 = vmatprep.subr.msk.bf16.mxu0 %vm463_vm0, %v1524_v18  ;;  %1212 = vmatprep.subr.msk.bf16.mxu1 %vm463_vm0, %v1524_v18 }
  0x28   : > { %858 = vperm.xlu0 %1275, %v833_v52   ;;  %v397_v52 = vsub.f32 %v1471_v4, %v365_v41  ;;  %v363_v4 = vunpack.c.l.bf16 %v1512_v14  ;;  %v396_v41 = vsub.f32 %v1502_v12, %v364_v6 }
  0x29   : > { %923 = vperm.xlu1 %1276, %v902_v59   ;;  %v379_v59 = vunpack.c.l.bf16 %v1492_v10 }
  0x2a   : > { %v395_v35 = vsub.f32 %v1499_v11, %v363_v4  ;;  %v361_v11 = vunpack.c.l.bf16 %v1538_v21  ;;  %v358_v4 = vunpack.c.h.bf16 %v1596_v37 }
  0x2c   : > { %863 = vperm.xlu0 %1275, %v834_v58   ;;  %v421_v12 = vpack.c.bf16 %v396_v41, %v395_v35  ;;  %v390_v35 = vsub.f32 %v1582_v34, %v358_v4 }
  0x2d   : > { %928 = vperm.xlu1 %1276, %v903_v13   ;;  %v422_v13 = vpack.c.bf16 %v398_v53, %v397_v52 }
  0x2e   : > { %1119 = vmatpush3.bf16.xpose.msra.mxu0 %v492_v24  ;;  %1143 = vmatpush3.bf16.xpose.msra.mxu1 %v492_v24  ;;  %v1690_v24 = vpack.c.bf16 %v1678_v62, %v1675_v61 }
  0x2f   : > { %1205 = vmatprep.subr.msk.bf16.mxu0 %vm463_vm0, %v1550_v25  ;;  %1213 = vmatprep.subr.msk.bf16.mxu1 %vm463_vm0, %v1550_v25 }
  0x30   : > { %868 = vperm.xlu0 %1275, %v835_v63   ;;  %v380_v63 = vunpack.c.h.bf16 %v1492_v10 }
  0x32   : > { %v412_v3 = vsub.f32 %v1484_v8, %v380_v63  ;;  %v1741_v8 = vld [vmem:[%s1911_s3 + $0x8] sm:$0xff]  }
  0x36   : > { %1121 = vmatpush3.bf16.xpose.msra.mxu0 %v489_v31  ;;  %1145 = vmatpush3.bf16.xpose.msra.mxu1 %v489_v31  ;;  %v381_v31 = vunpack.c.l.bf16 %v1475_v5  ;;  %v905_v5 = vld [vmem:[%s1914_s6 + $0x30] sm:$0x3] }
  0x37   : > { %1206 = vmatprep.subr.msk.bf16.mxu0 %vm463_vm0, %v1576_v32  ;;  %1214 = vmatprep.subr.msk.bf16.mxu1 %vm463_vm0, %v1576_v32 }
  0x38   : > { %v413_v9 = vsub.f32 %v1465_v2, %v381_v31  ;;  %938 = vperm.xlu1 %1276, %v905_v5   ;;  %v411_v2 = vsub.f32 %v1481_v7, %v379_v59  ;;  %v377_v31 = vunpack.c.l.bf16 %v1524_v18  ;;  %v1279_v7 = vld [vmem:[%s1912_s4 + $0x8] sm:$0xff]   ;;  %v410_v18 = vsub.f32 %v1518_v16, %v378_v42  ;;  %v1281_v16 = vld [vmem:[%s1912_s4 + $0x10] sm:$0xff]  }
  0x39   : > { %v375_v5 = vunpack.c.l.bf16 %v1550_v25  ;;  %v373_v59 = vunpack.c.l.bf16 %v1576_v32  ;;  %v369_v42 = vunpack.c.l.bf16 %v1652_v55 }
  0x3a   : > { %v430_v58 = vpack.c.bf16 %v414_v48, %v413_v9  ;;  %v429_v10 = vpack.c.bf16 %v412_v3, %v411_v2  ;;  %v409_v14 = vsub.f32 %v1515_v15, %v377_v31  ;;  %v715_v9 = vsel %vm463_vm0, %v421_v12, 0 }
  0x3b   : > { %v376_v15 = vunpack.c.h.bf16 %v1550_v25  ;;  %v407_v25 = vsub.f32 %v1541_v22, %v375_v5  ;;  %v374_v22 = vunpack.c.h.bf16 %v1576_v32  ;;  %v405_v32 = vsub.f32 %v1567_v29, %v373_v59 }
  0x3c   : > { %v428_v48 = vpack.c.bf16 %v410_v18, %v409_v14  ;;  %v372_v29 = vunpack.c.h.bf16 %v1614_v44  ;;  %v354_v18 = vunpack.c.h.bf16 %v1672_v60 }
  0x3d   : > { %v408_v53 = vsub.f32 %v1544_v23, %v376_v15  ;;  %v1283_v23 = vld [vmem:[%s1912_s4 + $0x18] ss:$0 sps:$4 sm:$0x11]   ;;  %v406_v3 = vsub.f32 %v1570_v30, %v374_v22  ;;  %v355_v30 = vunpack.c.l.bf16 %v1634_v49 }
  0x3e   : > { %1123 = vmatpush3.bf16.xpose.msra.mxu0 %v486_v43  ;;  %1147 = vmatpush3.bf16.xpose.msra.mxu1 %v486_v43  ;;  %v904_v43 = vld [vmem:[%s1914_s6 + $0x28] sm:$0xff]  ;;  %v404_v34 = vsub.f32 %v1602_v39, %v372_v29  ;;  %v353_v39 = vunpack.c.l.bf16 %v1672_v60  ;;  %v386_v5 = vsub.f32 %v1658_v57, %v354_v18  ;;  %v352_v60 = vunpack.c.h.bf16 %v1714_v47 }
  0x3f   : > { %1207 = vmatprep.subr.msk.bf16.mxu0 %vm463_vm0, %v1614_v44  ;;  %1215 = vmatprep.subr.msk.bf16.mxu1 %vm463_vm0, %v1614_v44  ;;  %v387_v41 = vsub.f32 %v1617_v45, %v355_v30  ;;  %v401_v45 = vsub.f32 %v1637_v50, %v369_v42 }
  0x40   : > { %933 = vperm.xlu0 %1275, %v904_v43   ;;  %v362_v43 = vunpack.c.h.bf16 %v1538_v21  ;;  %v1767_v21 = vld [vmem:[%s1911_s3 + $0x10] sm:$0xff]   ;;  %v384_v15 = vsub.f32 %v1698_v40, %v352_v60 }
  0x42   : > { %v394_v52 = vsub.f32 %v1530_v20, %v362_v43  ;;  %v385_v43 = vsub.f32 %v1655_v56, %v353_v39  ;;  %v351_v56 = vunpack.c.l.bf16 %v1714_v47 }
  0x44   : > { %v416_v50 = vpack.c.bf16 %v386_v5, %v385_v43 }
  0x46   : > { %1125 = vmatpush3.bf16.xpose.msra.mxu0 %v483_v54  ;;  %1149 = vmatpush3.bf16.xpose.msra.mxu1 %v483_v54  ;;  %v477_v54 = vsel %vm463_vm0, %v1714_v47, 0 }
  0x47   : > { %1208 = vmatprep.subr.msk.bf16.mxu0 %vm463_vm0, %v1652_v55  ;;  %1216 = vmatprep.subr.msk.bf16.mxu1 %vm463_vm0, %v1652_v55 }
  0x4e   : > { %1127 = vmatpush3.bf16.xpose.msra.mxu0 %v480_v17  ;;  %1151 = vmatpush3.bf16.xpose.msra.mxu1 %v480_v17  ;;  %v718_v17 = vsel %vm463_vm0, %v422_v13, 0  ;;  %v427_v13 = vpack.c.bf16 %v408_v53, %v407_v25 }
  0x4f   : > { %1209 = vmatprep.subr.msk.bf16.mxu0 %vm463_vm0, %v1690_v24  ;;  %1217 = vmatprep.subr.msk.bf16.mxu1 %vm463_vm0, %v1690_v24 }
  0x56   : > { %1129 = vmatpush3.bf16.xpose.msra.mxu0 %v477_v54  ;;  %1153 = vmatpush3.bf16.xpose.msra.mxu1 %v477_v54  ;;  %v360_v54 = vunpack.c.h.bf16 %v1564_v28 }
  0x57   : > { %1218 = vmatprep.subr.msk.bf16.mxu0 %vm463_vm0, %v430_v58  ;;  %1219 = vmatprep.subr.msk.bf16.mxu1 %vm463_vm0, %v430_v58 }
  0x58   : > { %v392_v2 = vsub.f32 %v1556_v27, %v360_v54 }
  0x5d   : > { %1131 = vmatmul.mubr.msk.bf16.vlgmr.msra.gmra.mxu0 %vm463_vm0, %v1448_v0  ;;  %1155 = vmatmul.mubr.msk.bf16.vlgmr.msra.gmra.mxu1 %vm463_vm0, %v1453_v1  ;;  %v393_v0 = vsub.f32 %v1527_v19, %v361_v11  ;;  %v359_v19 = vunpack.c.l.bf16 %v1564_v28  ;;  %v1792_v28 = vld [vmem:[%s1911_s3 + $0x18] ss:$0 sps:$4 sm:$0x11]  }
  0x5e   : > { %1163 = vmatpush3.bf16.xpose.msra.mxu0 %v718_v17  ;;  %1194 = vmatpush3.bf16.xpose.msra.mxu1 %v718_v17  ;;  %v371_v17 = vunpack.c.l.bf16 %v1614_v44  ;;  %v356_v44 = vunpack.c.h.bf16 %v1634_v49 }
  0x5f   : > { %1220 = vmatprep.subr.msk.bf16.mxu0 %vm463_vm0, %v429_v10  ;;  %1221 = vmatprep.subr.msk.bf16.mxu1 %vm463_vm0, %v429_v10  ;;  %v420_v20 = vpack.c.bf16 %v394_v52, %v393_v0  ;;  %v391_v58 = vsub.f32 %v1553_v26, %v359_v19  ;;  %v357_v26 = vunpack.c.l.bf16 %v1596_v37  ;;  %v426_v10 = vpack.c.bf16 %v406_v3, %v405_v32 }
  0x60   : > { %1132 = vmatprep.mubr.msk.bf16.mxu0 %vm463_vm0, %v1279_v7  ;;  %1156 = vmatprep.mubr.msk.bf16.mxu1 %vm463_vm0, %v1741_v8  ;;  %v403_v37 = vsub.f32 %v1599_v38, %v371_v17  ;;  %v388_v12 = vsub.f32 %v1620_v46, %v356_v44  ;;  %v370_v38 = vunpack.c.h.bf16 %v1652_v55  ;;  %v367_v46 = vunpack.c.l.bf16 %v1690_v24 }
  0x61   : > { %v712_v63 = vsel %vm463_vm0, %v420_v20, 0  ;;  %v419_v27 = vpack.c.bf16 %v392_v2, %v391_v58  ;;  %v389_v6 = vsub.f32 %v1579_v33, %v357_v26  ;;  %v700_v52 = vsel %vm463_vm0, %v416_v50, 0 }
  0x62   : > { %v425_v11 = vpack.c.bf16 %v404_v34, %v403_v37  ;;  %v417_v49 = vpack.c.bf16 %v388_v12, %v387_v41  ;;  %v402_v14 = vsub.f32 %v1640_v51, %v370_v38 }
  0x63   : > { %v709_v31 = vsel %vm463_vm0, %v419_v27, 0  ;;  %v418_v33 = vpack.c.bf16 %v390_v35, %v389_v6 }
  0x64   : > { %v703_v55 = vsel %vm463_vm0, %v417_v49, 0  ;;  %v424_v0 = vpack.c.bf16 %v402_v14, %v401_v45 }
  0x65   : > { %1133 = vmatmul.mubr.msk.bf16.gmra.mxu0 %vm463_vm0, %v1279_v7  ;;  %1157 = vmatmul.mubr.msk.bf16.gmra.mxu1 %vm463_vm0, %v1741_v8  ;;  %v706_v7 = vsel %vm463_vm0, %v418_v33, 0 }
  0x66   : > { %1165 = vmatpush3.bf16.xpose.msra.mxu0 %v715_v9  ;;  %1195 = vmatpush3.bf16.xpose.msra.mxu1 %v715_v9  ;;  %v368_v9 = vunpack.c.h.bf16 %v1690_v24  ;;  %v383_v24 = vsub.f32 %v1695_v36, %v351_v56 }
  0x67   : > { %1222 = vmatprep.subr.msk.bf16.mxu0 %vm463_vm0, %v428_v48  ;;  %1223 = vmatprep.subr.msk.bf16.mxu1 %vm463_vm0, %v428_v48  ;;  %v399_v48 = vsub.f32 %v1675_v61, %v367_v46 }
  0x68   : > { %1134 = vmatprep.mubr.msk.bf16.mxu0 %vm463_vm0, %v1281_v16  ;;  %1158 = vmatprep.mubr.msk.bf16.mxu1 %vm463_vm0, %v1767_v21  ;;  %v400_v51 = vsub.f32 %v1678_v62, %v368_v9  ;;  %v415_v61 = vpack.c.bf16 %v384_v15, %v383_v24 }
  0x6a   : > { %v423_v57 = vpack.c.bf16 %v400_v51, %v399_v48  ;;  %v697_v62 = vsel %vm463_vm0, %v415_v61, 0 }
  0x6d   : > { %1135 = vmatmul.mubr.msk.bf16.gmra.mxu0 %vm463_vm0, %v1281_v16  ;;  %1159 = vmatmul.mubr.msk.bf16.gmra.mxu1 %vm463_vm0, %v1767_v21 }
  0x6e   : > { %1167 = vmatpush3.bf16.xpose.msra.mxu0 %v712_v63  ;;  %1196 = vmatpush3.bf16.xpose.msra.mxu1 %v712_v63 }
  0x6f   : > { %1224 = vmatprep.subr.msk.bf16.mxu0 %vm463_vm0, %v427_v13  ;;  %1225 = vmatprep.subr.msk.bf16.mxu1 %vm463_vm0, %v427_v13 }
  0x70   : > { %1136 = vmatprep.mubr.msk.bf16.mxu0 %vm463_vm0, %v1283_v23  ;;  %1160 = vmatprep.mubr.msk.bf16.mxu1 %vm463_vm0, %v1792_v28 }
  0x75   : > { %1137 = vmatmul.mubr.msk.bf16.gmra.mxu0 %vm463_vm0, %v1283_v23  ;;  %1161 = vmatmul.mubr.msk.bf16.gmra.mxu1 %vm463_vm0, %v1792_v28 }
  0x76   : > { %1169 = vmatpush3.bf16.xpose.msra.mxu0 %v709_v31  ;;  %1197 = vmatpush3.bf16.xpose.msra.mxu1 %v709_v31 }
  0x77   : > { %1226 = vmatprep.subr.msk.bf16.mxu0 %vm463_vm0, %v426_v10  ;;  %1227 = vmatprep.subr.msk.bf16.mxu1 %vm463_vm0, %v426_v10 }
  0x78   : > { %1178 = vmatprep.mubr.msk.bf16.mxu0 %vm463_vm0, %v1453_v1  ;;  %1182 = vmatprep.mubr.msk.bf16.mxu1 %vm463_vm0, %v1767_v21 }
  0x7e   : > { %1171 = vmatpush3.bf16.xpose.msra.mxu0 %v706_v7  ;;  %1198 = vmatpush3.bf16.xpose.msra.mxu1 %v706_v7 }
  0x7f   : > { %1228 = vmatprep.subr.msk.bf16.mxu0 %vm463_vm0, %v425_v11  ;;  %1229 = vmatprep.subr.msk.bf16.mxu1 %vm463_vm0, %v425_v11 }
  0x86   : > { %1173 = vmatpush3.bf16.xpose.msra.mxu0 %v703_v55  ;;  %1199 = vmatpush3.bf16.xpose.msra.mxu1 %v703_v55 }
  0x87   : > { %1230 = vmatprep.subr.msk.bf16.mxu0 %vm463_vm0, %v424_v0  ;;  %1231 = vmatprep.subr.msk.bf16.mxu1 %vm463_vm0, %v424_v0 }
  0x8e   : > { %1175 = vmatpush3.bf16.xpose.msra.mxu0 %v700_v52  ;;  %1200 = vmatpush3.bf16.xpose.msra.mxu1 %v700_v52 }
  0x8f   : > { %1232 = vmatprep.subr.msk.bf16.mxu0 %vm463_vm0, %v423_v57  ;;  %1233 = vmatprep.subr.msk.bf16.mxu1 %vm463_vm0, %v423_v57 }
  0x94   : > { %v839_v11 = vpop.permute.xlu0 %838  ;;  %v849_v12 = vpop.permute.xlu1 %848 }
  0x96   : > { %1177 = vmatpush3.bf16.xpose.msra.mxu0 %v697_v62  ;;  %1201 = vmatpush3.bf16.xpose.msra.mxu1 %v697_v62 }
  0x98   : > { %v844_v38 = vpop.permute.xlu0 %843  ;;  %v1868_v39 = vpop.permute.xlu1 %853 }
  0x9c   : > { %v914_v45 = vpop.permute.xlu1 %913 }
  0x9d   : > { %1179 = vmatmul.mubr.msk.bf16.vlgmr.msra.gmra.mxu0 %vm463_vm0, %v1453_v1  ;;  %1183 = vmatmul.mubr.msk.bf16.vlgmr.msra.gmra.mxu1 %vm463_vm0, %v1767_v21  ;;  %v909_v49 = vpop.permute.xlu0 %908 }
  0x9e   : > { %1180 = vmatprep.mubr.msk.bf16.mxu0 %vm463_vm0, %v1741_v8  ;;  %1184 = vmatprep.mubr.msk.bf16.mxu1 %vm463_vm0, %v1792_v28 }
  0xa0   : > { %v919_v5 = vpop.permute.xlu1 %918 }
  0xa3   : > { %v859_v43 = vpop.permute.xlu0 %858 }
  0xa5   : > { %1181 = vmatmul.mubr.msk.bf16.gmra.mxu0 %vm463_vm0, %v1741_v8  ;;  %1185 = vmatmul.mubr.msk.bf16.gmra.mxu1 %vm463_vm0, %v1792_v28 }
 0x11d   : > { %v558_v36 = vpop.f32.mrf.mxu0  ;;  %v659_v40 = vpop.f32.mrf.mxu1 }
 0x11e   : > { %v660_v47 = vadd.f32 %v659_v40, %v558_v36  ;;  %v864_v36 = vpop.permute.xlu0 %863 }
 0x11f   : > { %v560_v16 = vpop.f32.mrf.mxu0  ;;  %v661_v1 = vpop.f32.mrf.mxu1 }
 0x120   : > { %v662_v19 = vadd.f32 %v661_v1, %v560_v16 }
 0x121   : > { %v562_v20 = vpop.f32.mrf.mxu0  ;;  %v663_v21 = vpop.f32.mrf.mxu1 }
 0x122   : > { %v664_v25 = vadd.f32 %v663_v21, %v562_v20 }
 0x123   : > { %v564_v53 = vpop.f32.mrf.mxu0  ;;  %v665_v54 = vpop.f32.mrf.mxu1 }
 0x124   : > { %v666_v58 = vadd.f32 %v665_v54, %v564_v53 }
 0x125   : > { %v568_v59 = vpop.f32.mrf.mxu0  ;;  %v669_v63 = vpop.f32.mrf.mxu1 }
 0x126   : > { %v670_v13 = vadd.f32 %v669_v63, %v568_v59  ;;  %v924_v59 = vpop.permute.xlu1 %923 }
 0x127   : > { %v570_v2 = vpop.f32.mrf.mxu0  ;;  %v671_v8 = vpop.f32.mrf.mxu1 }
 0x128   : > { %v1864_v22 = vadd.f32 %v671_v8, %v570_v2 }
 0x129   : > { %v572_v23 = vpop.f32.mrf.mxu0  ;;  %v673_v28 = vpop.f32.mrf.mxu1 }
 0x12a   : > { %v1866_v26 = vadd.f32 %v673_v28, %v572_v23 }
 0x12b   : > { %v574_v27 = vpop.f32.mrf.mxu0  ;;  %v675_v32 = vpop.f32.mrf.mxu1 }
 0x12c   : > { %v676_v61 = vadd.f32 %v675_v32, %v574_v27 }
 0x12d   : > { %v578_v3 = vpop.f32.mrf.mxu0  ;;  %v679_v4 = vpop.f32.mrf.mxu1 }
 0x12e   : > { %v680_v48 = vadd.f32 %v679_v4, %v578_v3 }
 0x12f   : > { %v580_v6 = vpop.f32.mrf.mxu0  ;;  %v681_v17 = vpop.f32.mrf.mxu1 }
 0x130   : > { %v682_v62 = vadd.f32 %v681_v17, %v580_v6 }
 0x131   : > { %v582_v31 = vpop.f32.mrf.mxu0  ;;  %v683_v10 = vpop.f32.mrf.mxu1 }
 0x132   : > { %v684_v40 = vadd.f32 %v683_v10, %v582_v31 }
 0x133   : > { %v584_v35 = vpop.f32.mrf.mxu0  ;;  %v685_v29 = vpop.f32.mrf.mxu1 }
 0x134   : > { %v686_v53 = vadd.f32 %v685_v29, %v584_v35 }
 0x135   : > { %v588_v30 = vpop.f32.mrf.mxu0  ;;  %v689_v33 = vpop.f32.mrf.mxu1 }
 0x137   : > { %v590_v37 = vpop.f32.mrf.mxu0  ;;  %v691_v34 = vpop.f32.mrf.mxu1 }
 0x138   : > { %v692_v54 = vadd.f32 %v691_v34, %v590_v37 }
 0x139   : > { %v592_v44 = vpop.f32.mrf.mxu0  ;;  %v693_v41 = vpop.f32.mrf.mxu1 }
 0x13b   : > { %v593_v42 = vpop.f32.mrf.mxu0  ;;  %v694_v7 = vpop.f32.mrf.mxu1 }
 0x15d   : > { %v778_v14 = vpop.f32.mrf.mxu0  ;;  %v798_v18 = vpop.f32.mrf.mxu1 }
 0x15e   : > { %v815_v46 = vadd.f32 %v778_v14, %v660_v47  ;;  %v823_v60 = vadd.f32 %v798_v18, %v680_v48 }
 0x15f   : > { %v780_v55 = vpop.f32.mrf.mxu0  ;;  %v800_v0 = vpop.f32.mrf.mxu1 }
 0x160   : > { %v816_v9 = vadd.f32 %v780_v55, %v662_v19  ;;  %v871_v50 = vadd.f32 %v839_v11, %v815_v46  ;;  %v690_v19 = vadd.f32 %v689_v33, %v588_v30  ;;  %v879_v2 = vadd.f32 %v859_v43, %v823_v60  ;;  %v869_v30 = vpop.permute.xlu0 %868  ;;  %v929_v55 = vpop.permute.xlu1 %928 }
 0x161   : > { %v782_v51 = vpop.f32.mrf.mxu0  ;;  %v802_v56 = vpop.f32.mrf.mxu1  ;;  %v824_v27 = vadd.f32 %v800_v0, %v682_v62 }
 0x162   : > { %v872_v52 = vadd.f32 %v839_v11, %v816_v9  ;;  %v817_v57 = vadd.f32 %v782_v51, %v664_v25  ;;  %v885_v16 = vmax.f32 %v871_v50, 0.0  ;;  %v825_v31 = vadd.f32 %v802_v56, %v684_v40 }
 0x163   : > { %v784_v24 = vpop.f32.mrf.mxu0  ;;  %v804_v15 = vpop.f32.mrf.mxu1  ;;  %v880_v14 = vadd.f32 %v859_v43, %v824_v27 }
 0x164   : > { %v873_v1 = vadd.f32 %v844_v38, %v817_v57  ;;  %v818_v47 = vadd.f32 %v784_v24, %v666_v58  ;;  %v886_v8 = vmax.f32 %v872_v52, 0.0  ;;  %v941_v17 = vmul.f32 %v909_v49, %v885_v16 }
 0x165   : > { %v788_v20 = vpop.f32.mrf.mxu0  ;;  %v808_v21 = vpop.f32.mrf.mxu1  ;;  %v826_v33 = vadd.f32 %v804_v15, %v686_v53  ;;  %v881_v0 = vadd.f32 %v864_v36, %v825_v31  ;;  %v894_v43 = vmax.f32 %v880_v14, 0.0 }
 0x166   : > { %v819_v63 = vadd.f32 %v788_v20, %v670_v13  ;;  %v887_v23 = vmax.f32 %v873_v1, 0.0  ;;  %v874_v25 = vadd.f32 %v844_v38, %v818_v47  ;;  %v827_v4 = vadd.f32 %v808_v21, %v690_v19  ;;  %v939_v1 = vpop.permute.xlu1 %938  ;;  %v934_v21 = vpop.permute.xlu0 %933 }
 0x167   : > { %v790_v28 = vpop.f32.mrf.mxu0  ;;  %v810_v3 = vpop.f32.mrf.mxu1  ;;  %v942_v44 = vmul.f32 %v909_v49, %v886_v8  ;;  %v893_v49 = vmax.f32 %v879_v2, 0.0  ;;  %v882_v60 = vadd.f32 %v864_v36, %v826_v33  ;;  %v895_v24 = vmax.f32 %v881_v0, 0.0 }
 0x168   : > { %v875_v32 = vadd.f32 %v849_v12, %v819_v63  ;;  %v820_v6 = vadd.f32 %v790_v28, %v1864_v22  ;;  %v943_v58 = vmul.f32 %v914_v45, %v887_v23  ;;  %v888_v10 = vmax.f32 %v874_v25, 0.0 }
 0x169   : > { %v792_v35 = vpop.f32.mrf.mxu0  ;;  %v812_v29 = vpop.f32.mrf.mxu1  ;;  %v828_v34 = vadd.f32 %v810_v3, %v692_v54  ;;  %v883_v18 = vadd.f32 %v869_v30, %v827_v4  ;;  %v949_v16 = vmul.f32 %v929_v55, %v893_v49  ;;  %v896_v47 = vmax.f32 %v882_v60, 0.0 }
 0x16a   : > { %v889_v13 = vmax.f32 %v875_v32, 0.0  ;;  %v876_v37 = vadd.f32 %v849_v12, %v820_v6  ;;  %v955_v41 = vadd.f32 %v943_v58, %v941_v17  ;;  %v944_v42 = vmul.f32 %v914_v45, %v888_v10 }
 0x16b   : > { %v821_v7 = vadd.f32 %v792_v35, %v1866_v26  ;;  %v794_v11 = vpop.f32.mrf.mxu0  ;;  %v813_v38 = vpop.f32.mrf.mxu1  ;;  %v884_v56 = vadd.f32 %v869_v30, %v828_v34  ;;  %v897_v52 = vmax.f32 %v883_v18, 0.0  ;;  %v950_v53 = vmul.f32 %v929_v55, %v894_v43 }
 0x16c   : > { %v945_v22 = vmul.f32 %v919_v5, %v889_v13  ;;  %v890_v46 = vmax.f32 %v876_v37, 0.0  ;;  %v969_v9 = vadd.f32 %v944_v42, %v942_v44  ;;  %v822_v50 = vadd.f32 %v794_v11, %v676_v61 }
 0x16d   : > { %v877_v48 = vadd.f32 %v1868_v39, %v821_v7  ;;  %v898_v40 = vmax.f32 %v884_v56, 0.0  ;;  %v951_v36 = vmul.f32 %v934_v21, %v895_v24  ;;  %v952_v63 = vmul.f32 %v934_v21, %v896_v47 }
 0x16e   : > { %v956_v51 = vadd.f32 %v955_v41, %v945_v22  ;;  %v946_v12 = vmul.f32 %v919_v5, %v890_v46  ;;  %v878_v26 = vadd.f32 %v1868_v39, %v822_v50  ;;  %v953_v5 = vmul.f32 %v939_v1, %v897_v52 }
 0x16f   : > { %v891_v45 = vmax.f32 %v877_v48, 0.0  ;;  %v954_v39 = vmul.f32 %v939_v1, %v898_v40  ;;  %v988_v58 = vlaneseq  ;;  %v983_v30 = vstv %s982_s17 }
 0x170   : > { %v970_v57 = vadd.f32 %v969_v9, %v946_v12  ;;  %v892_v62 = vmax.f32 %v878_v26, 0.0  ;;  %v961_v23 = vsel %vm960_vm1, %v953_v5, 0.0  ;;  %v991_v41 = vstv %s987_s21 }
 0x171   : > { %v947_v15 = vmul.f32 %v924_v59, %v891_v45  ;;  %v974_v3 = vsel %vm960_vm1, %v954_v39, 0.0  ;;  %v989_v33 = vshrl.u32 %v988_v58, 7 }
 0x172   : > { %v948_v61 = vmul.f32 %v924_v59, %v892_v62 }
 0x173   : > { %v957_v20 = vadd.f32 %v956_v51, %v947_v15  ;;  %vm990_vm2 = vcmp.eq.s32.totalorder %v989_v33, 0 }
 0x174   : > { %v971_v54 = vadd.f32 %v970_v57, %v948_v61 }
 0x175   : > { %v958_v19 = vadd.f32 %v957_v20, %v949_v16 }
 0x176   : > { %v972_v8 = vadd.f32 %v971_v54, %v950_v53 }
 0x177   : > { %v959_v2 = vadd.f32 %v958_v19, %v951_v36 }
 0x178   : > { %v973_v28 = vadd.f32 %v972_v8, %v952_v63 }
 0x179   : > { %v962_v25 = vadd.f32 %v961_v23, %v959_v2 }
 0x17a   : > { %v975_v32 = vadd.f32 %v974_v3, %v973_v28 }
 0x17b   : > { %v963_v27 = vrot.slane %v962_v25, 4 }
 0x17c   : > { %v976_v4 = vrot.slane %v975_v32, 4 }
 0x17d   : > { %v964_v59 = vadd.f32 %v963_v27, %v962_v25 }
 0x17e   : > { %v977_v6 = vadd.f32 %v976_v4, %v975_v32 }
 0x17f   : > { %v965_v17 = vrot.slane %v964_v59, 2 }
 0x180   : > { %v978_v10 = vrot.slane %v977_v6, 2 }
 0x181   : > { %v966_v31 = vadd.f32 %v965_v17, %v964_v59 }
 0x182   : > { %v979_v29 = vadd.f32 %v978_v10, %v977_v6 }
 0x183   : > { %v967_v35 = vrot.slane %v966_v31, 1 }
 0x184   : > { %v980_v37 = vrot.slane %v979_v29, 1 }
 0x185   : > { %v968_v13 = vadd.f32 %v967_v35, %v966_v31 }
 0x186   : > { %v981_v34 = vadd.f32 %v980_v37, %v979_v29 }
 0x187   : > { %v984_v44 = vadd.f32 %v983_v30, %v968_v13 }
 0x188   : > { %v985_v42 = vadd.f32 %v983_v30, %v981_v34 }
 0x189   : > { %v992_v7 = vsel %vm990_vm2, %v984_v44, %v991_v41 }
 0x18a   : > { %v993_v11 = vsel %vm990_vm2, %v985_v42, %v991_v41 }
 0x18b   : > { %v996_v38 = vcombine.low %v992_v7, %v993_v11 }
 0x18d   : > { %1107 = vst.sshfl [vmem:[%s286_s24] sm:$0x33 pattern:$0x76325410] %v996_v38 }
 0x18e   : > { %1298 = shalt.err (!%p1295_p3)
}
 0x18f   : > { %s1299_s17 = scalar_lea.hbm %s1019_s1, 64  ;;  %s1303_s20 = scalar_lea.hbm %s1915_s7, 256 }
 0x190   : > { %p1300_p4 = scmp.ne.s32.totalorder %s1019_s1, %s1299_s17  ;;  %p1304_p9 = scmp.lt.s32.totalorder %s1019_s1, %s1915_s7 }
 0x191   : > { %p1305_p10 = scmp.lt.s32.totalorder %s1303_s20, %s1299_s17 }
 0x192   : > { %p1301_p7 = pnand %p1300_p4, %p1434_p5 }
 0x193   : > { %p1306_p11 = por %p1305_p10, %p1304_p9 }
 0x194   : > { %p1302_p8 = pneg %p1301_p7 }
 0x196   : > { %p1307_p12 = pnand %p1306_p11, %p1302_p8 }
 0x198   : > { %1310 = shalt.err (!%p1307_p12)
}
 0x199   : > { %1234 = dma.vmem_to_hbm [thread:$0]  (%p1434_p5), %s1022_s25, 64, %s1019_s1, %s1007_s10  }
 0x19a PF: > { %p1240_p13 = scmp.ge.s32.totalorder %s1345_s8, 2  ;;  %s1033_s22 = sand.u32 1, %s1333_s28  }
 0x19b   : > { %s1034_s24 = scalar_lea.sflag [#allocation5], %s1033_s22 }
 0x19c   : > { %p1237_p0 = pnand %p1240_p13, %p1438_p6 }
 0x19e   : > { %p1238_p1 = pneg %p1237_p0 }
 0x1a0   : > { %1328 = dma.done.wait (%p1238_p1), %s1034_s24, 64  }
 0x1a1   : > { %1330 = vsyncadd (%p1238_p1), %s1034_s24, 4294967232  ;;  %p19_p2 = scmp.ge.s32.totalorder %s1421_s9, 6   ;;  %s1918_s28 = smov %s1337_s29 }
 0x1a2   : > { %s1919_s29 = smov %s1341_s30  ;;  %s1920_s30 = smov %s1432_s12 }
 0x1a3   : > { %s1921_s8 = smov %s1421_s9  ;;  %21 = sbr.rel (!%p19_p2) target bundleno = 6 (0x6), region = 83 }
 0x1a8   :  { %1039 = vsyncpa [#allocation5], 1 }
 0x1a9   :  { %1041 = vsyncpa [#allocation5 + $0x1], 1 }

</bundles_post_ra>
